<compile_context>
chip_gen: v6e
topology: v6e:2x2x1
jax: 0.10.0
libtpu: 0.0.40
codegen_flags: <defaults>
</compile_context>

<pallas_src>
import jax
import jax.numpy as jnp
from jax.experimental import pallas as pl
from jax.experimental.pallas import tpu as pltpu


# ----------------------------------------------------------------------------
# Kernels: acc(f32) += x(bm,bk) · W(bn,bk)^T on the MXU; fused bias in epilogue.
# Weight stays in PyTorch (N, K) layout — the contraction handles the transpose.
# ----------------------------------------------------------------------------
_DNUMS = (((1,), (1,)), ((), ()))  # contract dim 1 of x with dim 1 of W


def _linear_bias_kernel(x_ref, w_ref, b_ref, o_ref, acc_ref):
    k = pl.program_id(2)

    @pl.when(k == 0)
    def _init():
        acc_ref[...] = jnp.zeros_like(acc_ref)

    acc_ref[...] += jax.lax.dot_general(
        x_ref[...], w_ref[...], dimension_numbers=_DNUMS,
        preferred_element_type=jnp.float32)

    @pl.when(k == pl.num_programs(2) - 1)
    def _fini():
        o_ref[...] = (acc_ref[...] + b_ref[...].astype(jnp.float32)).astype(o_ref.dtype)


def _linear_nobias_kernel(x_ref, w_ref, o_ref, acc_ref):
    k = pl.program_id(2)

    @pl.when(k == 0)
    def _init():
        acc_ref[...] = jnp.zeros_like(acc_ref)

    acc_ref[...] += jax.lax.dot_general(
        x_ref[...], w_ref[...], dimension_numbers=_DNUMS,
        preferred_element_type=jnp.float32)

    @pl.when(k == pl.num_programs(2) - 1)
    def _fini():
        o_ref[...] = acc_ref[...].astype(o_ref.dtype)


# ----------------------------------------------------------------------------
# Tiling helpers: generation-aware VMEM budget + dtype-aware alignment.
# ----------------------------------------------------------------------------
def _vmem_capacity_bytes():
    try:
        info = pltpu.get_tpu_info()
        cap = getattr(info, "vmem_capacity_bytes", None)
        if cap:
            return int(cap)
    except Exception:
        pass
    return 64 * 1024 * 1024  # safe lower bound (v7x per-TC VMEM)


def _round_down(v, align):
    return max(align, (v // align) * align)


def _vmem_footprint(bm, bn, bk, in_bytes, out_bytes):
    # double-buffered x / W / out tiles + f32 accumulator scratch + padded bias tile
    return (2 * bm * bk * in_bytes
            + 2 * bn * bk * in_bytes
            + 2 * bm * bn * out_bytes
            + bm * bn * 4
            + 2 * 8 * bn * 4)


def _shrink_to_budget(bm, bn, bk, budget, in_bytes, out_bytes, m_align):
    for _ in range(64):
        if _vmem_footprint(bm, bn, bk, in_bytes, out_bytes) <= budget:
            break
        if bk > 128:
            bk = _round_down(bk // 2, 128)
        elif bm > m_align:
            bm = _round_down(bm // 2, m_align)
        elif bn > 128:
            bn = _round_down(bn // 2, 128)
        else:
            break
    return bm, bn, bk


# ----------------------------------------------------------------------------
# Wrapper mirroring MetaLinearLayer.forward: F.linear(x, weights, bias).
#   x:       (M, K)
#   weights: (N, K)   -- PyTorch layout (num_filters, in_features), NOT transposed
#   bias:    (N,) or None
#   returns  (M, N) in x.dtype
# compute_dtype=jnp.bfloat16 enables the fast (non-bit-exact) MXU path.
# ----------------------------------------------------------------------------
def meta_linear_forward(x, weights, bias=None, *, compute_dtype=None):
    M, K = x.shape
    N, K2 = weights.shape
    assert K == K2, (x.shape, weights.shape)

    out_dtype = x.dtype
    if compute_dtype is not None:
        x = x.astype(compute_dtype)
        weights = weights.astype(compute_dtype)

    in_bytes = jnp.dtype(x.dtype).itemsize
    out_bytes = jnp.dtype(out_dtype).itemsize
    m_align = {4: 8, 2: 16, 1: 32}.get(in_bytes, 8)

    cap = _vmem_capacity_bytes()
    vmem_limit = int(cap * 0.8)            # leave headroom for compiler scratch
    block_budget = int(vmem_limit * 0.9)

    big_vmem = cap >= 100 * 1024 * 1024    # v5e/v6e (128 MiB) vs v7x (64 MiB)
    tgt_mn = 1024 if big_vmem else 512
    tgt_k = 4096 if big_vmem else 2048

    bm = M if M <= tgt_mn else _round_down(tgt_mn, m_align)
    bn = N if N <= tgt_mn else _round_down(tgt_mn, 128)
    bk = K if K <= tgt_k else _round_down(tgt_k, 128)

    # v7x: 2 TensorCores shard "parallel" grid axes — avoid a (1,1) grid when N
    # can be split into lane-dense (128-multiple) halves. Neutral on v5e/v6e.
    if pl.cdiv(M, bm) == 1 and pl.cdiv(N, bn) == 1 and N >= 256 and N % 128 == 0:
        bn = _round_down(N // 2, 128)

    bm, bn, bk = _shrink_to_budget(bm, bn, bk, block_budget,
                                   in_bytes, out_bytes, m_align)

    grid = (pl.cdiv(M, bm), pl.cdiv(N, bn), pl.cdiv(K, bk))

    compiler_params = pltpu.CompilerParams(
        dimension_semantics=("parallel", "parallel", "arbitrary"),
        vmem_limit_bytes=vmem_limit,
    )

    x_spec = pl.BlockSpec((bm, bk), lambda i, j, k: (i, k))
    w_spec = pl.BlockSpec((bn, bk), lambda i, j, k: (j, k))   # (N, K) layout, no transpose
    o_spec = pl.BlockSpec((bm, bn), lambda i, j, k: (i, j))
    scratch = [pltpu.VMEM((bm, bn), jnp.float32)]
    # TODO(synk): if profiling shows exposed DMA waits on the weight stream at
    # large K, add pipeline_mode=pl.Buffered(3) to w_spec.

    if bias is not None:
        b_spec = pl.BlockSpec((1, bn), lambda i, j, k: (0, j))
        return pl.pallas_call(
            _linear_bias_kernel,
            out_shape=jax.ShapeDtypeStruct((M, N), out_dtype),
            grid=grid,
            in_specs=[x_spec, w_spec, b_spec],
            out_specs=o_spec,
            scratch_shapes=scratch,
            compiler_params=compiler_params,
        )(x, weights, bias.reshape(1, N).astype(jnp.float32))

    return pl.pallas_call(
        _linear_nobias_kernel,
        out_shape=jax.ShapeDtypeStruct((M, N), out_dtype),
        grid=grid,
        in_specs=[x_spec, w_spec],
        out_specs=o_spec,
        scratch_shapes=scratch,
        compiler_params=compiler_params,
    )(x, weights)


# ----------------------------------------------------------------------------
# Deterministic parameter construction matching MetaLinearLayer.__init__:
#   weights: xavier_uniform_ over shape (num_filters, in_features)
#   bias:    zeros (when use_bias=True)
# ----------------------------------------------------------------------------
def init_params(key, in_features, num_filters, use_bias=True):
    bound = (6.0 / (in_features + num_filters)) ** 0.5
    weights = jax.random.uniform(
        key, (num_filters, in_features), minval=-bound, maxval=bound,
        dtype=jnp.float32)
    params = {"weights": weights}
    if use_bias:
        params["bias"] = jnp.zeros((num_filters,), jnp.float32)
    return params


if __name__ == "__main__":
    key = jax.random.PRNGKey(0)
    k_x, k_w, k_b = jax.random.split(key, 3)

    # Small shapes consistent with the module: input_shape = (batch, features).
    # num_filters=256 keeps the output lane-dense and exercises the N split.
    batch, in_features, num_filters = 8, 32, 256
    use_bias = True

    x = jax.random.normal(k_x, (batch, in_features), dtype=jnp.float32)
    params = init_params(k_w, in_features, num_filters, use_bias=use_bias)

    # Simulate meta-learning "fast weights" passed via forward(x, params=...):
    # same weights, a non-zero bias so the bias path is actually exercised.
    fast_bias = 0.1 * jax.random.normal(k_b, (num_filters,), dtype=jnp.float32)
    weights = params["weights"]
    bias = fast_bias if use_bias else None

    ref = x @ weights.T
    if use_bias:
        ref = ref + bias[None, :]

    # f32 path: bit-comparable with the PyTorch reference.
    out = jax.block_until_ready(meta_linear_forward(x, weights, bias))
    assert out.shape == (batch, num_filters), out.shape
    assert jnp.allclose(out, ref, rtol=1e-5, atol=1e-5), \
        float(jnp.max(jnp.abs(out - ref)))

    # bf16 fast path: half DMA bytes, native MXU path, f32 accumulation.
    out_bf16 = jax.block_until_ready(
        meta_linear_forward(x, weights, bias, compute_dtype=jnp.bfloat16))
    assert jnp.allclose(out_bf16, ref, rtol=5e-2, atol=5e-2), \
        float(jnp.max(jnp.abs(out_bf16 - ref)))

    print("KERNEL_OK")
</pallas_src>

<mosaic_0001>
module attributes {stable_mosaic.version = 11 : i64} {
  func.func @_linear_bias_kernel(%arg0: i32, %arg1: i32, %arg2: i32, %arg3: memref<8x32xf32, #tpu.memory_space<vmem>>, %arg4: memref<128x32xf32, #tpu.memory_space<vmem>>, %arg5: memref<1x128xf32, #tpu.memory_space<vmem>>, %arg6: memref<8x128xf32, #tpu.memory_space<vmem>>, %arg7: memref<8x128xf32, #tpu.memory_space<vmem>>) attributes {dimension_semantics = [#tpu.dimension_semantics<parallel>, #tpu.dimension_semantics<parallel>, #tpu.dimension_semantics<arbitrary>], iteration_bounds = array<i64: 1, 2, 1>, scalar_prefetch = 0 : i64, scratch_operands = 1 : i64, tpu.core_type = #tpu.core_type<tc>, window_params = [{transform_indices = @transform_0, window_bounds = array<i64: 8, 32>}, {transform_indices = @transform_1, window_bounds = array<i64: 128, 32>}, {transform_indices = @transform_2, window_bounds = array<i64: 1, 128>}, {transform_indices = @transform_3, window_bounds = array<i64: 8, 128>}]} {
    %c0_i32 = arith.constant 0 : i32
    %0 = arith.cmpi eq, %arg2, %c0_i32 : i32
    %1 = arith.extui %0 : i1 to i32
    %c0_i32_0 = arith.constant 0 : i32
    %2 = arith.cmpi ne, %1, %c0_i32_0 : i32
    scf.if %2 {
      %cst_10 = arith.constant 0.000000e+00 : f32
      %12 = vector.broadcast %cst_10 : f32 to vector<8x128xf32>
      %c0_11 = arith.constant 0 : index
      %c0_12 = arith.constant 0 : index
      %13 = vector.load %arg7[%c0_11, %c0_12] : memref<8x128xf32, #tpu.memory_space<vmem>>, vector<8x128xf32>
      tpu.vector_store %arg7[%c0_11, %c0_12], %12 {strides = array<i32>} : memref<8x128xf32, #tpu.memory_space<vmem>>, vector<8x128xf32>,
    } else {
    }
    %c0 = arith.constant 0 : index
    %c0_1 = arith.constant 0 : index
    %3 = vector.load %arg7[%c0, %c0_1] : memref<8x128xf32, #tpu.memory_space<vmem>>, vector<8x128xf32>
    %c0_2 = arith.constant 0 : index
    %c0_3 = arith.constant 0 : index
    %4 = vector.load %arg3[%c0_2, %c0_3] : memref<8x32xf32, #tpu.memory_space<vmem>>, vector<8x32xf32>
    %c0_4 = arith.constant 0 : index
    %c0_5 = arith.constant 0 : index
    %5 = vector.load %arg4[%c0_4, %c0_5] : memref<128x32xf32, #tpu.memory_space<vmem>>, vector<128x32xf32>
    %cst = arith.constant dense<0.000000e+00> : vector<8x128xf32>
    %6 = tpu.matmul %4, %5, %cst {dimension_numbers = #tpu.dot_dimension_numbers<[1], [1], [0], [0], [0, 0, 1, 0], [], []>} : vector<8x32xf32>, vector<128x32xf32>, vector<8x128xf32> -> vector<8x128xf32>
    %7 = arith.addf %3, %6 : vector<8x128xf32>
    %c0_6 = arith.constant 0 : index
    %c0_7 = arith.constant 0 : index
    %8 = vector.load %arg7[%c0_6, %c0_7] : memref<8x128xf32, #tpu.memory_space<vmem>>, vector<8x128xf32>
    tpu.vector_store %arg7[%c0_6, %c0_7], %7 {strides = array<i32>} : memref<8x128xf32, #tpu.memory_space<vmem>>, vector<8x128xf32>,
    %c0_i32_8 = arith.constant 0 : i32
    %9 = arith.cmpi eq, %arg2, %c0_i32_8 : i32
    %10 = arith.extui %9 : i1 to i32
    %c0_i32_9 = arith.constant 0 : i32
    %11 = arith.cmpi ne, %10, %c0_i32_9 : i32
    scf.if %11 {
      %c0_10 = arith.constant 0 : index
      %c0_11 = arith.constant 0 : index
      %12 = vector.load %arg7[%c0_10, %c0_11] : memref<8x128xf32, #tpu.memory_space<vmem>>, vector<8x128xf32>
      %c0_12 = arith.constant 0 : index
      %c0_13 = arith.constant 0 : index
      %13 = vector.load %arg5[%c0_12, %c0_13] : memref<1x128xf32, #tpu.memory_space<vmem>>, vector<1x128xf32>
      %14 = vector.broadcast %13 : vector<1x128xf32> to vector<8x128xf32>
      %15 = arith.addf %12, %14 : vector<8x128xf32>
      %c0_14 = arith.constant 0 : index
      %c0_15 = arith.constant 0 : index
      %16 = vector.load %arg6[%c0_14, %c0_15] : memref<8x128xf32, #tpu.memory_space<vmem>>, vector<8x128xf32>
      tpu.vector_store %arg6[%c0_14, %c0_15], %15 {strides = array<i32>} : memref<8x128xf32, #tpu.memory_space<vmem>>, vector<8x128xf32>,
    } else {
    }
    return
  }
  func.func @transform_0(%arg0: i32, %arg1: i32, %arg2: i32) -> (i32, i32) {
    %c0_i32 = arith.constant 0 : i32
    return %arg0, %arg2 : i32, i32
  }
  func.func @transform_1(%arg0: i32, %arg1: i32, %arg2: i32) -> (i32, i32) {
    %c0_i32 = arith.constant 0 : i32
    return %arg1, %arg2 : i32, i32
  }
  func.func @transform_2(%arg0: i32, %arg1: i32, %arg2: i32) -> (i32, i32) {
    %c0_i32 = arith.constant 0 : i32
    %c0_i32_0 = arith.constant 0 : i32
    return %c0_i32, %arg1 : i32, i32
  }
  func.func @transform_3(%arg0: i32, %arg1: i32, %arg2: i32) -> (i32, i32) {
    %c0_i32 = arith.constant 0 : i32
    return %arg0, %arg1 : i32, i32
  }
}

</mosaic_0001>

<bundles_post_ra>
// kernel: tpu_custom_call.1
= control target key start
LH: loop header
LB: loop body
LE: loop exit
PB: predicated region body
PF: predicated region fallthrough
CT: control target
= control target key end

     0   :  { %8 = vsyncpa [#allocation4], 0  ;;  %s911_s0 = inlined_call_operand.vmem [shape: f32[8,32], index: 0, kind: input, shape index: {}]   ;;  %s912_s1 = inlined_call_operand.vmem [shape: f32[256,32], index: 1, kind: input, shape index: {}]   ;;  %s913_s2 = inlined_call_operand.vmem [shape: f32[1,256], index: 2, kind: input, shape index: {}]   ;;  %s914_s3 = inlined_call_operand.hbm [shape: f32[8,256], index: 3, kind: output, shape index: {}]  }
   0x1   :  { %10 = vsyncpa [#allocation4 + $0x1], 0  ;;  %s764_s12 = smov 0   ;;  %s766_s13 = smov 0  }
   0x2   :  { %s768_s14 = smov 0   ;;  %s770_s15 = smov 0  }
   0x3   :  { %s772_s16 = smov 0   ;;  %s774_s17 = smov 0  }
   0x4 LB: > { %s523_s18 = sadd.s32 4294967295, %s739_s17   ;;  %s524_s19 = sadd.s32 4294967294, %s739_s17   ;;  %s739_s17 = sphi %s774_s17, %s16_s17   ;;  %s735_s16 = sphi %s772_s16, %s921_s16   ;;  %s731_s15 = sphi %s770_s15, %s920_s15   ;;  %s727_s14 = sphi %s768_s14, %s919_s14   ;;  %s723_s13 = sphi %s766_s13, %s918_s13   ;;  %s719_s12 = sphi %s764_s12, %s917_s12  }
   0x5   : > { %s31_s20 = sadd.s32 1, %s735_s16  ;;  %s126_s21 = sadd.s32 1, %s727_s14 }
   0x6   : > { %p33_p0 = scmp.ge.s32.totalorder %s31_s20, 2  ;;  %p136_p1 = scmp.ne.s32.totalorder %s727_s14, %s723_s13 }
   0x7   : > { %p137_p2 = scmp.eq.s32.totalorder %s523_s18, 1  ;;  %p142_p3 = scmp.ne.s32.totalorder %s723_s13, %s719_s12 }
   0x8   : > { %s923_s20 = smov (%p33_p0, %s31_s20), 0  ;;  %p143_p5 = scmp.eq.s32.totalorder %s524_s19, 1 }
   0x9   : > { %p804_p4 = por %p137_p2, %p136_p1  ;;  %s122_s23 = ssub.s32 %s735_s16, %s923_s20 }
   0xa   : > { %p528_p6 = scmp.ge.s32.totalorder %s739_s17, 1  ;;  %p124_p7 = scmp.eq.s32.totalorder %s122_s23, 0 }
   0xb   : > { %p811_p8 = por %p143_p5, %p142_p3  ;;  %p189_p9 = scmp.lt.s32.totalorder %s739_s17, 3 }
   0xc   : > { %s817_s25 = scalar_select %p124_p7, %s727_s14, %s126_s21  }
   0xd   : > { %p190_p10 = pnand %p528_p6, %p189_p9 }
   0xe   : > { %s530_s26 = sshll.u32 (!%p190_p10), %s731_s15, 4  ;;  %p242_p12 = scmp.lt.s32.totalorder (!%p190_p10), %s731_s15, 1 }
   0xf   : > { %193 = sbr.rel (%p190_p10) target bundleno = 295 (0x127), region = 32  ;;  %p234_p11 = scmp.lt.s32.totalorder (!%p190_p10), %s530_s26, 31 }
  0x10   : > { %s223_s6 = sand.u32 (!%p190_p10), 1, %s723_s13   ;;  %s551_s18 = sshll.u32 (!%p190_p10), %s731_s15, 7 }
  0x11   : > { %s529_s8 = sshll.u32 (!%p190_p10), %s223_s6, 3  ;;  %s406_s28 = scalar_lea.sflag (!%p190_p10), [#allocation4], %s223_s6 }
  0x12   : > { %s225_s19 = scalar_lea.vmem (!%p190_p10), [#allocation3], %s529_s8 }
  0x13   : > { %s421_s21 = sshll.u32 (!%p190_p10), %s225_s19, 4  ;;  %s422_s21 = int_to_ptr.vmem [resolvable:$true] %s421_s21 }
  0x14   : > { %v741_v0 = vmov 0.0   ;;  %vm742_vm0 = vmmov 0   ;;  %s925_s26 = smov (!%p234_p11, %s530_s26), 31  ;;  %vm268_vm1 = vcmask 261120   ;;  %v251_v17 = vld [vmem:[%s911_s0] sm:$0xff]  ;;  %s663_s29 = scalar_lea.vmem %s422_s21, 128 }
  0x15   : > { %571 = vmatprep.subr.mxu0 %v741_v0  ;;  %603 = vmatprep.mubr.msk.f32.mxu0 %vm742_vm0, %v741_v0  ;;  %s531_s27 = sshll.u32 %s925_s26, 3  ;;  %p664_p13 = scmp.ne.s32.totalorder %s422_s21, %s663_s29 }
  0x16   : > { %s823_s30 = scalar_lea.vmem %s912_s1, %s531_s27  ;;  %s871_s27 = scalar_lea.hbm %s914_s3, %s551_s18 }
  0x17   : > { %v267_v1 = vld [vmem:[%s823_s30 + $0x78] sm:$0xff]  ;;  %v266_v2 = vld [vmem:[%s823_s30 + $0x70] sm:$0xff]  ;;  %v265_v3 = vld [vmem:[%s823_s30 + $0x68] sm:$0xff]  ;;  %s243_s7 = scalar_select %p242_p12, %s731_s15, 1 }
  0x18   : > { %572 = vmatpush3.xpose.msk.msra.mxu0 %vm268_vm1, %v267_v1  ;;  %v264_v4 = vld [vmem:[%s823_s30 + $0x60] sm:$0xff]  ;;  %v263_v5 = vld [vmem:[%s823_s30 + $0x58] sm:$0xff]  ;;  %v262_v6 = vld [vmem:[%s823_s30 + $0x50] sm:$0xff]  ;;  %p665_p0 = pnand %p664_p13, %p804_p4 }
  0x19   : > { %573 = vmatprep.subr.mxu0 %v741_v0  ;;  %v261_v7 = vld [vmem:[%s823_s30 + $0x48] sm:$0xff]  ;;  %v260_v8 = vld [vmem:[%s823_s30 + $0x40] sm:$0xff]  ;;  %v259_v9 = vld [vmem:[%s823_s30 + $0x38] sm:$0xff]  ;;  %s244_s11 = scalar_lea.vmem %s913_s2, %s243_s7 }
  0x1a   : > { %v258_v10 = vld [vmem:[%s823_s30 + $0x30] sm:$0xff]  ;;  %v257_v11 = vld [vmem:[%s823_s30 + $0x28] sm:$0xff]  ;;  %v256_v12 = vld [vmem:[%s823_s30 + $0x20] sm:$0xff]  ;;  %p666_p1 = pneg %p665_p0 }
  0x1b   : > { %v255_v13 = vld [vmem:[%s823_s30 + $0x18] sm:$0xff]  ;;  %v254_v14 = vld [vmem:[%s823_s30 + $0x10] sm:$0xff]  ;;  %v253_v15 = vld [vmem:[%s823_s30 + $0x8] sm:$0xff] }
  0x1c   : > { %574 = vmatpush3.xpose.msk.msra.mxu0 %vm268_vm1, %v266_v2  ;;  %v252_v16 = vld [vmem:[%s823_s30] sm:$0xff]  ;;  %s743_s30 = smov [#allocation3]  }
  0x1d   : > { %575 = vmatprep.subr.mxu0 %v741_v0  ;;  %v549_v18 = vld [vmem:[%s244_s11] ss:$0 sm:$0xff]  ;;  %s667_s15 = sshll.u32 %s743_s30, 4  ;;  %s668_s15 = int_to_ptr.vmem [resolvable:$false] %s667_s15 }
  0x1e   : > { %s669_s4 = scalar_lea.vmem %s668_s15, 256  ;;  %p670_p2 = scmp.lt.s32.totalorder %s422_s21, %s668_s15 }
  0x1f   : > { %p671_p3 = scmp.lt.s32.totalorder %s669_s4, %s663_s29 }
  0x20   : > { %576 = vmatpush3.xpose.msk.msra.mxu0 %vm268_vm1, %v265_v3 }
  0x21   : > { %577 = vmatprep.subr.mxu0 %v741_v0  ;;  %p672_p5 = por %p671_p3, %p670_p2 }
  0x23   : > { %p673_p6 = pnand %p672_p5, %p666_p1 }
  0x24   : > { %578 = vmatpush3.xpose.msk.msra.mxu0 %vm268_vm1, %v264_v4 }
  0x25   : > { %579 = vmatprep.subr.mxu0 %v741_v0 }
  0x28   : > { %580 = vmatpush3.xpose.msk.msra.mxu0 %vm268_vm1, %v263_v5 }
  0x29   : > { %581 = vmatprep.subr.mxu0 %v741_v0 }
  0x2c   : > { %582 = vmatpush3.xpose.msk.msra.mxu0 %vm268_vm1, %v262_v6 }
  0x2d   : > { %583 = vmatprep.subr.mxu0 %v741_v0 }
  0x30   : > { %584 = vmatpush3.xpose.msk.msra.mxu0 %vm268_vm1, %v261_v7 }
  0x31   : > { %585 = vmatprep.subr.mxu0 %v741_v0 }
  0x34   : > { %586 = vmatpush3.xpose.msk.msra.mxu0 %vm268_vm1, %v260_v8 }
  0x35   : > { %587 = vmatprep.subr.mxu0 %v741_v0 }
  0x38   : > { %588 = vmatpush3.xpose.msk.msra.mxu0 %vm268_vm1, %v259_v9 }
  0x39   : > { %589 = vmatprep.subr.mxu0 %v741_v0 }
  0x3c   : > { %590 = vmatpush3.xpose.msk.msra.mxu0 %vm268_vm1, %v258_v10 }
  0x3d   : > { %591 = vmatprep.subr.mxu0 %v741_v0 }
  0x40   : > { %592 = vmatpush3.xpose.msk.msra.mxu0 %vm268_vm1, %v257_v11 }
  0x41   : > { %593 = vmatprep.subr.mxu0 %v741_v0 }
  0x44   : > { %594 = vmatpush3.xpose.msk.msra.mxu0 %vm268_vm1, %v256_v12 }
  0x45   : > { %595 = vmatprep.subr.mxu0 %v741_v0 }
  0x48   : > { %596 = vmatpush3.xpose.msk.msra.mxu0 %vm268_vm1, %v255_v13 }
  0x49   : > { %597 = vmatprep.subr.mxu0 %v741_v0 }
  0x4c   : > { %598 = vmatpush3.xpose.msk.msra.mxu0 %vm268_vm1, %v254_v14 }
  0x4d   : > { %599 = vmatprep.subr.mxu0 %v741_v0 }
  0x50   : > { %600 = vmatpush3.xpose.msk.msra.mxu0 %vm268_vm1, %v253_v15 }
  0x51   : > { %601 = vmatprep.subr.mxu0 %v741_v0 }
  0x54   : > { %602 = vmatpush3.xpose.msk.msra.mxu0 %vm268_vm1, %v252_v16 }
  0x57   : > { %604 = vmatmul.mubr.msk.f32.vlgmr.msra.gmra.mxu0 %vm268_vm1, %v251_v17 }
 0x117   : > { %v386_v19 = vpop.f32.mrf.mxu0 }
 0x118   : > { %v403_v20 = vadd.f32 %v549_v18, %v386_v19 }
 0x119   : > { %v605_v21 = vpop.f32.mrf.mxu0 }
 0x11a   : > { %404 = vst [vmem:[%s225_s19] sm:$0xff] %v403_v20 }
 0x11b   : > { %676 = shalt.err (!%p673_p6)
}
 0x11c   : > { %s677_s5 = scalar_lea.hbm %s871_s27, 128  ;;  %s681_s8 = scalar_lea.hbm %s914_s3, 256 }
 0x11d   : > { %p678_p7 = scmp.ne.s32.totalorder %s871_s27, %s677_s5  ;;  %p682_p11 = scmp.lt.s32.totalorder %s871_s27, %s914_s3 }
 0x11e   : > { %p683_p12 = scmp.lt.s32.totalorder %s681_s8, %s677_s5 }
 0x11f   : > { %p679_p9 = pnand %p678_p7, %p804_p4 }
 0x120   : > { %p684_p13 = por %p683_p12, %p682_p11 }
 0x121   : > { %p680_p10 = pneg %p679_p9 }
 0x123   : > { %p685_p0 = pnand %p684_p13, %p680_p10 }
 0x125   : > { %688 = shalt.err (!%p685_p0)
}
 0x126   : > { %606 = dma.vmem_to_hbm [thread:$0]  (%p804_p4), %s422_s21, 128, %s871_s27, %s406_s28  }
 0x127 PF: > { %p612_p1 = scmp.ge.s32.totalorder %s739_s17, 2  ;;  %s433_s11 = sand.u32 1, %s719_s12  }
 0x128   : > { %s434_s18 = scalar_lea.sflag [#allocation4], %s433_s11 }
 0x129   : > { %p609_p2 = pnand %p612_p1, %p811_p8 }
 0x12b   : > { %p610_p3 = pneg %p609_p2 }
 0x12d   : > { %714 = dma.done.wait (%p610_p3), %s434_s18, 128  }
 0x12e   : > { %716 = vsyncadd (%p610_p3), %s434_s18, 4294967168  ;;  %s16_s17 = sadd.s32 1, %s739_s17   ;;  %s917_s12 = smov %s723_s13 }
 0x12f   : > { %p13_p5 = scmp.ge.s32.totalorder %s16_s17, 4   ;;  %s918_s13 = smov %s727_s14 }
 0x130   : > { %s919_s14 = smov %s817_s25  ;;  %s920_s15 = smov %s735_s16 }
 0x131   : > { %s921_s16 = smov %s923_s20  ;;  %15 = sbr.rel (!%p13_p5) target bundleno = 4 (0x4), region = 81 }
 0x136   :  { %439 = vsyncpa [#allocation4], 1 }
 0x137   :  { %441 = vsyncpa [#allocation4 + $0x1], 1 }

</bundles_post_ra>
